<compile_context>
chip_gen: v5e
topology: v5e:2x2
jax: 0.10.0
libtpu: 0.0.40
codegen_flags: <defaults>
</compile_context>

<pallas_src>
import jax
import jax.numpy as jnp
from jax.experimental import pallas as pl
from jax.experimental.pallas import tpu as pltpu

C_PAD = 128  # single lane-dense slab holding ALL members' class logits


def _make_kernel(M, C_CLS):
    def kernel(x_ref, w_ref, b_ref, ew_ref, o_ref, acc_ref):
        # x_ref  : VMEM (B_TILE, TK)   bf16  input tile
        # w_ref  : VMEM (TK, 128)      bf16  packed member weights (zero pad cols)
        # b_ref  : VMEM (1, 128)       f32   packed biases (zero pad cols)
        # ew_ref : VMEM (1, 128)       f32   per-lane ensemble weight of owning member
        # o_ref  : VMEM (B_TILE, 128)  f32   weighted per-member probability slab
        # acc_ref: VMEM (B_TILE, 128)  f32   logits accumulator (scratch)
        k = pl.program_id(1)

        @pl.when(k == 0)
        def _init():
            acc_ref[...] = jnp.zeros_like(acc_ref)

        # One MXU pass per K tile (bf16 operands, f32 accumulate).
        acc_ref[...] += jnp.dot(x_ref[...], w_ref[...],
                                preferred_element_type=jnp.float32)

        @pl.when(k == pl.num_programs(1) - 1)
        def _epilogue():
            logits = acc_ref[...] + b_ref[...]           # bias added exactly once
            lane = jax.lax.broadcasted_iota(jnp.int32, logits.shape, 1)
            probs = jnp.zeros_like(logits)
            for m in range(M):                           # M small & static: unrolled
                # Masked softmax over member m's lanes of the shared slab.
                mask = (lane >= m * C_CLS) & (lane < (m + 1) * C_CLS)
                seg = jnp.where(mask, logits, -1e30)     # non-member lanes excluded
                mx = jnp.max(seg, axis=-1, keepdims=True)
                e = jnp.exp(seg - mx)                    # non-member lanes -> 0
                denom = jnp.sum(e, axis=-1, keepdims=True)
                probs = probs + e * pl.reciprocal(denom, approx=True)  # EUP slot
            # Each lane belongs to exactly one member -> one lane-wise weighting.
            o_ref[...] = probs * ew_ref[...]

    return kernel


def crack_detector_ensemble(x_nchw, Ws, bs, ens_w, *, tk=512, b_tile=256):
    """x_nchw: [B,C,H,W]; Ws: [M,D,C_CLS]; bs: [M,C_CLS]; ens_w: [M]."""
    B = x_nchw.shape[0]
    M, D, C_CLS = Ws.shape
    # TODO(synk): for M*C_CLS > 128 split members across multiple 128-lane slabs.
    assert M * C_CLS <= C_PAD, "all members must fit one 128-lane slab"

    # Tile sizing. Demo default tk=512; at realistic D pick per generation:
    # v6e/v5e tk ~ 16384-32768 (raise vmem_limit on v5e, default scoped = 16 MiB),
    # v7x roughly half of the v6e tile (64 MiB physical VMEM).
    tk = min(tk, ((D + 127) // 128) * 128)
    D_PAD = ((D + tk - 1) // tk) * tk
    b_tile = min(b_tile, ((B + 15) // 16) * 16)          # bf16 sublane packing
    B_PAD = ((B + b_tile - 1) // b_tile) * b_tile
    nb, nk = B_PAD // b_tile, D_PAD // tk

    # ---- plain-JAX glue: flatten + pack to TPU-friendly layouts ----
    x_flat = x_nchw.reshape(B, D).astype(jnp.bfloat16)
    x_pad = jnp.zeros((B_PAD, D_PAD), jnp.bfloat16).at[:B, :D].set(x_flat)

    # All members packed into ONE 128-lane slab: member m -> lanes [m*C, (m+1)*C).
    W_fused = jnp.zeros((D_PAD, C_PAD), jnp.bfloat16).at[:D, :M * C_CLS].set(
        jnp.transpose(Ws, (1, 0, 2)).reshape(D, M * C_CLS).astype(jnp.bfloat16))
    b_fused = jnp.zeros((1, C_PAD), jnp.float32).at[0, :M * C_CLS].set(
        bs.reshape(M * C_CLS).astype(jnp.float32))
    ew_lanes = jnp.zeros((1, C_PAD), jnp.float32).at[0, :M * C_CLS].set(
        jnp.repeat(ens_w.astype(jnp.float32), C_CLS))

    grid_spec = pltpu.PrefetchScalarGridSpec(
        num_scalar_prefetch=0,
        grid=(nb, nk),
        in_specs=[
            pl.BlockSpec((b_tile, tk), lambda i, k: (i, k)),    # x tile
            pl.BlockSpec((tk, C_PAD), lambda i, k: (k, 0)),     # packed W tile
            pl.BlockSpec((1, C_PAD), lambda i, k: (0, 0)),      # packed bias
            pl.BlockSpec((1, C_PAD), lambda i, k: (0, 0)),      # per-lane ens. weight
        ],
        out_specs=pl.BlockSpec((b_tile, C_PAD), lambda i, k: (i, 0)),
        scratch_shapes=[pltpu.VMEM((b_tile, C_PAD), jnp.float32)],
    )

    bytes_accessed = (x_pad.size * 2 + W_fused.size * 2 + b_fused.size * 4
                      + ew_lanes.size * 4 + B_PAD * C_PAD * 4)
    cost = pl.CostEstimate(flops=2 * B_PAD * D_PAD * C_PAD,
                           transcendentals=M * B_PAD * C_PAD,
                           bytes_accessed=int(bytes_accessed))

    # Double-buffered input tiles + out + scratch, with generous headroom.
    vmem_est = 2 * (b_tile * tk * 2 + tk * C_PAD * 2 + 2 * C_PAD * 4
                    + b_tile * C_PAD * 4) + b_tile * C_PAD * 4
    vmem_limit = int(min(max(4 * vmem_est, 8 << 20), 32 << 20))

    out_pad = pl.pallas_call(
        _make_kernel(M, C_CLS),
        out_shape=jax.ShapeDtypeStruct((B_PAD, C_PAD), jnp.float32),
        grid_spec=grid_spec,
        compiler_params=pltpu.CompilerParams(
            dimension_semantics=("parallel", "arbitrary"),
            vmem_limit_bytes=vmem_limit),
        cost_estimate=cost,
    )(x_pad, W_fused, b_fused, ew_lanes)

    # Member m's weighted probabilities live in lanes [m*C_CLS, (m+1)*C_CLS);
    # the final member-sum is a trivial [B, M, C_CLS] reduction in plain JAX.
    return out_pad[:B, :M * C_CLS].reshape(B, M, C_CLS).sum(axis=1)


def reference(x_nchw, Ws, bs, ens_w):
    """Pure-JAX f32 reference matching the PyTorch module semantics."""
    B = x_nchw.shape[0]
    M, D, C_CLS = Ws.shape
    x_flat = x_nchw.reshape(B, D).astype(jnp.float32)
    out = jnp.zeros((B, C_CLS), jnp.float32)
    for m in range(M):
        logits = x_flat @ Ws[m] + bs[m]
        out = out + ens_w[m] * jax.nn.softmax(logits, axis=1)
    return out


if __name__ == "__main__":
    # NCHW image input, 2-class (crack / no-crack) output, 3 ensemble members.
    B, C, H, W = 2, 4, 16, 16
    D = C * H * W          # 1024 -> 2 K-tiles of 512 exercise the accumulator path
    C_CLS = 2
    M = 3

    key = jax.random.PRNGKey(0)
    kx, kw, kb = jax.random.split(key, 3)
    x = jax.random.normal(kx, (B, C, H, W), jnp.float32)
    Ws = jax.random.normal(kw, (M, D, C_CLS), jnp.float32) * 0.02
    bs = jax.random.normal(kb, (M, C_CLS), jnp.float32) * 0.1
    ens_w = jnp.array([0.5, 0.3, 0.2], jnp.float32)   # custom ensemble weights

    out = crack_detector_ensemble(x, Ws, bs, ens_w)
    out = jax.block_until_ready(out)

    ref = reference(x, Ws, bs, ens_w)
    assert out.shape == (B, C_CLS)
    # bf16 matmul operands -> compare probabilities at bf16-appropriate tolerance
    assert jnp.allclose(out, ref, atol=1e-2, rtol=1e-2), (out, ref)
    # rows sum to sum(ens_w); tolerance loosened for the approx (EUP) reciprocal
    assert jnp.allclose(out.sum(axis=1), ens_w.sum(), atol=5e-3), out.sum(axis=1)

    print("KERNEL_OK")
</pallas_src>

<mosaic_0001>
module attributes {stable_mosaic.version = 11 : i64} {
  func.func @kernel(%arg0: i32, %arg1: i32, %arg2: memref<16x512xbf16, #tpu.memory_space<vmem>>, %arg3: memref<512x128xbf16, #tpu.memory_space<vmem>>, %arg4: memref<1x128xf32, #tpu.memory_space<vmem>>, %arg5: memref<1x128xf32, #tpu.memory_space<vmem>>, %arg6: memref<16x128xf32, #tpu.memory_space<vmem>>, %arg7: memref<16x128xf32, #tpu.memory_space<vmem>>) attributes {dimension_semantics = [#tpu.dimension_semantics<parallel>, #tpu.dimension_semantics<arbitrary>], iteration_bounds = array<i64: 1, 2>, scalar_prefetch = 0 : i64, scratch_operands = 1 : i64, tpu.core_type = #tpu.core_type<tc>, window_params = [{transform_indices = @transform_0, window_bounds = array<i64: 16, 512>}, {transform_indices = @transform_1, window_bounds = array<i64: 512, 128>}, {pipeline_mode = #tpu.pipeline_mode<synchronous>, transform_indices = @transform_2, window_bounds = array<i64: 1, 128>}, {pipeline_mode = #tpu.pipeline_mode<synchronous>, transform_indices = @transform_3, window_bounds = array<i64: 1, 128>}, {transform_indices = @transform_4, window_bounds = array<i64: 16, 128>}]} {
    %c0_i32 = arith.constant 0 : i32
    %0 = arith.cmpi eq, %arg1, %c0_i32 : i32
    %1 = arith.extui %0 : i1 to i32
    %c0_i32_0 = arith.constant 0 : i32
    %2 = arith.cmpi ne, %1, %c0_i32_0 : i32
    scf.if %2 {
      %cst_9 = arith.constant 0.000000e+00 : f32
      %12 = vector.broadcast %cst_9 : f32 to vector<16x128xf32>
      %c0_10 = arith.constant 0 : index
      %c0_11 = arith.constant 0 : index
      %13 = vector.load %arg7[%c0_10, %c0_11] : memref<16x128xf32, #tpu.memory_space<vmem>>, vector<16x128xf32>
      tpu.vector_store %arg7[%c0_10, %c0_11], %12 {strides = array<i32>} : memref<16x128xf32, #tpu.memory_space<vmem>>, vector<16x128xf32>,
    } else {
    }
    %c0 = arith.constant 0 : index
    %c0_1 = arith.constant 0 : index
    %3 = vector.load %arg7[%c0, %c0_1] : memref<16x128xf32, #tpu.memory_space<vmem>>, vector<16x128xf32>
    %c0_2 = arith.constant 0 : index
    %c0_3 = arith.constant 0 : index
    %4 = vector.load %arg2[%c0_2, %c0_3] : memref<16x512xbf16, #tpu.memory_space<vmem>>, vector<16x512xbf16>
    %c0_4 = arith.constant 0 : index
    %c0_5 = arith.constant 0 : index
    %5 = vector.load %arg3[%c0_4, %c0_5] : memref<512x128xbf16, #tpu.memory_space<vmem>>, vector<512x128xbf16>
    %cst = arith.constant dense<0.000000e+00> : vector<16x128xf32>
    %6 = tpu.matmul %4, %5, %cst {dimension_numbers = #tpu.dot_dimension_numbers<[1], [0], [0], [1], [0, 0, 1, 1], [], []>} : vector<16x512xbf16>, vector<512x128xbf16>, vector<16x128xf32> -> vector<16x128xf32>
    %7 = arith.addf %3, %6 : vector<16x128xf32>
    %c0_6 = arith.constant 0 : index
    %c0_7 = arith.constant 0 : index
    %8 = vector.load %arg7[%c0_6, %c0_7] : memref<16x128xf32, #tpu.memory_space<vmem>>, vector<16x128xf32>
    tpu.vector_store %arg7[%c0_6, %c0_7], %7 {strides = array<i32>} : memref<16x128xf32, #tpu.memory_space<vmem>>, vector<16x128xf32>,
    %c1_i32 = arith.constant 1 : i32
    %9 = arith.cmpi eq, %arg1, %c1_i32 : i32
    %10 = arith.extui %9 : i1 to i32
    %c0_i32_8 = arith.constant 0 : i32
    %11 = arith.cmpi ne, %10, %c0_i32_8 : i32
    scf.if %11 {
      %c0_9 = arith.constant 0 : index
      %c0_10 = arith.constant 0 : index
      %12 = vector.load %arg7[%c0_9, %c0_10] : memref<16x128xf32, #tpu.memory_space<vmem>>, vector<16x128xf32>
      %c0_11 = arith.constant 0 : index
      %c0_12 = arith.constant 0 : index
      %13 = vector.load %arg4[%c0_11, %c0_12] : memref<1x128xf32, #tpu.memory_space<vmem>>, vector<1x128xf32>
      %14 = vector.broadcast %13 : vector<1x128xf32> to vector<16x128xf32>
      %15 = arith.addf %12, %14 : vector<16x128xf32>
      %16 = tpu.iota {dimensions = array<i32: 1>} : vector<16x128xi32>
      %cst_13 = arith.constant 0.000000e+00 : f32
      %17 = vector.broadcast %cst_13 : f32 to vector<16x128xf32>
      %c0_i32_14 = arith.constant 0 : i32
      %18 = vector.broadcast %c0_i32_14 : i32 to vector<16x128xi32>
      %19 = arith.cmpi sge, %16, %18 : vector<16x128xi32>
      %c2_i32 = arith.constant 2 : i32
      %20 = vector.broadcast %c2_i32 : i32 to vector<16x128xi32>
      %21 = arith.cmpi slt, %16, %20 : vector<16x128xi32>
      %22 = arith.andi %19, %21 : vector<16x128xi1>
      %cst_15 = arith.constant -1.000000e+30 : f32
      %23 = vector.broadcast %cst_15 : f32 to vector<16x128xf32>
      %24 = arith.select %22, %15, %23 : vector<16x128xi1>, vector<16x128xf32>
      %cst_16 = arith.constant dense<0xFF800000> : vector<16xf32>
      %25 = vector.multi_reduction <maximumf>, %24, %cst_16 [1] : vector<16x128xf32> to vector<16xf32>
      %26 = vector.shape_cast %25 : vector<16xf32> to vector<16x1xf32>
      %27 = vector.broadcast %26 : vector<16x1xf32> to vector<16x128xf32>
      %28 = arith.subf %24, %27 : vector<16x128xf32>
      %29 = math.exp %28 : vector<16x128xf32>
      %cst_17 = arith.constant dense<0.000000e+00> : vector<16xf32>
      %30 = vector.multi_reduction <add>, %29, %cst_17 [1] : vector<16x128xf32> to vector<16xf32>
      %31 = vector.shape_cast %30 : vector<16xf32> to vector<16x1xf32>
      %32 = tpu.reciprocal %31 {approx = true} : vector<16x1xf32> -> vector<16x1xf32>
      %33 = vector.broadcast %32 : vector<16x1xf32> to vector<16x128xf32>
      %34 = arith.mulf %29, %33 : vector<16x128xf32>
      %35 = arith.addf %17, %34 : vector<16x128xf32>
      %c2_i32_18 = arith.constant 2 : i32
      %36 = vector.broadcast %c2_i32_18 : i32 to vector<16x128xi32>
      %37 = arith.cmpi sge, %16, %36 : vector<16x128xi32>
      %c4_i32 = arith.constant 4 : i32
      %38 = vector.broadcast %c4_i32 : i32 to vector<16x128xi32>
      %39 = arith.cmpi slt, %16, %38 : vector<16x128xi32>
      %40 = arith.andi %37, %39 : vector<16x128xi1>
      %cst_19 = arith.constant -1.000000e+30 : f32
      %41 = vector.broadcast %cst_19 : f32 to vector<16x128xf32>
      %42 = arith.select %40, %15, %41 : vector<16x128xi1>, vector<16x128xf32>
      %cst_20 = arith.constant dense<0xFF800000> : vector<16xf32>
      %43 = vector.multi_reduction <maximumf>, %42, %cst_20 [1] : vector<16x128xf32> to vector<16xf32>
      %44 = vector.shape_cast %43 : vector<16xf32> to vector<16x1xf32>
      %45 = vector.broadcast %44 : vector<16x1xf32> to vector<16x128xf32>
      %46 = arith.subf %42, %45 : vector<16x128xf32>
      %47 = math.exp %46 : vector<16x128xf32>
      %cst_21 = arith.constant dense<0.000000e+00> : vector<16xf32>
      %48 = vector.multi_reduction <add>, %47, %cst_21 [1] : vector<16x128xf32> to vector<16xf32>
      %49 = vector.shape_cast %48 : vector<16xf32> to vector<16x1xf32>
      %50 = tpu.reciprocal %49 {approx = true} : vector<16x1xf32> -> vector<16x1xf32>
      %51 = vector.broadcast %50 : vector<16x1xf32> to vector<16x128xf32>
      %52 = arith.mulf %47, %51 : vector<16x128xf32>
      %53 = arith.addf %35, %52 : vector<16x128xf32>
      %c4_i32_22 = arith.constant 4 : i32
      %54 = vector.broadcast %c4_i32_22 : i32 to vector<16x128xi32>
      %55 = arith.cmpi sge, %16, %54 : vector<16x128xi32>
      %c6_i32 = arith.constant 6 : i32
      %56 = vector.broadcast %c6_i32 : i32 to vector<16x128xi32>
      %57 = arith.cmpi slt, %16, %56 : vector<16x128xi32>
      %58 = arith.andi %55, %57 : vector<16x128xi1>
      %cst_23 = arith.constant -1.000000e+30 : f32
      %59 = vector.broadcast %cst_23 : f32 to vector<16x128xf32>
      %60 = arith.select %58, %15, %59 : vector<16x128xi1>, vector<16x128xf32>
      %cst_24 = arith.constant dense<0xFF800000> : vector<16xf32>
      %61 = vector.multi_reduction <maximumf>, %60, %cst_24 [1] : vector<16x128xf32> to vector<16xf32>
      %62 = vector.shape_cast %61 : vector<16xf32> to vector<16x1xf32>
      %63 = vector.broadcast %62 : vector<16x1xf32> to vector<16x128xf32>
      %64 = arith.subf %60, %63 : vector<16x128xf32>
      %65 = math.exp %64 : vector<16x128xf32>
      %cst_25 = arith.constant dense<0.000000e+00> : vector<16xf32>
      %66 = vector.multi_reduction <add>, %65, %cst_25 [1] : vector<16x128xf32> to vector<16xf32>
      %67 = vector.shape_cast %66 : vector<16xf32> to vector<16x1xf32>
      %68 = tpu.reciprocal %67 {approx = true} : vector<16x1xf32> -> vector<16x1xf32>
      %69 = vector.broadcast %68 : vector<16x1xf32> to vector<16x128xf32>
      %70 = arith.mulf %65, %69 : vector<16x128xf32>
      %71 = arith.addf %53, %70 : vector<16x128xf32>
      %c0_26 = arith.constant 0 : index
      %c0_27 = arith.constant 0 : index
      %72 = vector.load %arg5[%c0_26, %c0_27] : memref<1x128xf32, #tpu.memory_space<vmem>>, vector<1x128xf32>
      %73 = vector.broadcast %72 : vector<1x128xf32> to vector<16x128xf32>
      %74 = arith.mulf %71, %73 : vector<16x128xf32>
      %c0_28 = arith.constant 0 : index
      %c0_29 = arith.constant 0 : index
      %75 = vector.load %arg6[%c0_28, %c0_29] : memref<16x128xf32, #tpu.memory_space<vmem>>, vector<16x128xf32>
      tpu.vector_store %arg6[%c0_28, %c0_29], %74 {strides = array<i32>} : memref<16x128xf32, #tpu.memory_space<vmem>>, vector<16x128xf32>,
    } else {
    }
    return
  }
  func.func @transform_0(%arg0: i32, %arg1: i32) -> (i32, i32) {
    %c0_i32 = arith.constant 0 : i32
    return %arg0, %arg1 : i32, i32
  }
  func.func @transform_1(%arg0: i32, %arg1: i32) -> (i32, i32) {
    %c0_i32 = arith.constant 0 : i32
    %c0_i32_0 = arith.constant 0 : i32
    return %arg1, %c0_i32 : i32, i32
  }
  func.func @transform_2(%arg0: i32, %arg1: i32) -> (i32, i32) {
    %c0_i32 = arith.constant 0 : i32
    %c0_i32_0 = arith.constant 0 : i32
    %c0_i32_1 = arith.constant 0 : i32
    return %c0_i32, %c0_i32_0 : i32, i32
  }
  func.func @transform_3(%arg0: i32, %arg1: i32) -> (i32, i32) {
    %c0_i32 = arith.constant 0 : i32
    %c0_i32_0 = arith.constant 0 : i32
    %c0_i32_1 = arith.constant 0 : i32
    return %c0_i32, %c0_i32_0 : i32, i32
  }
  func.func @transform_4(%arg0: i32, %arg1: i32) -> (i32, i32) {
    %c0_i32 = arith.constant 0 : i32
    %c0_i32_0 = arith.constant 0 : i32
    return %arg0, %c0_i32 : i32, i32
  }
}

</mosaic_0001>

<bundles_post_ra>
// kernel: tpu_custom_call.1
= control target key start
LH: loop header
LB: loop body
LE: loop exit
PB: predicated region body
PF: predicated region fallthrough
CT: control target
= control target key end

     0   :  { %s1467_s0 = inlined_call_operand.hbm [shape: bf16[16,1024], index: 0, kind: input, shape index: {}]   ;;  %s1468_s1 = inlined_call_operand.hbm [shape: bf16[1024,128], index: 1, kind: input, shape index: {}]   ;;  %s1469_s2 = inlined_call_operand.vmem [shape: f32[1,128], index: 2, kind: input, shape index: {}]   ;;  %s1470_s3 = inlined_call_operand.vmem [shape: f32[1,128], index: 3, kind: input, shape index: {}]   ;;  %s1471_s4 = inlined_call_operand.hbm [shape: f32[16,128], index: 4, kind: output, shape index: {}]  }
   0x1   :  { %1473 = sst [smem:[#allocation12_spill]] %s1467_s0 }
   0x2   :  { %9 = vsyncpa [#allocation4], 0 }
   0x3   :  { %11 = vsyncpa [#allocation4 + $0x1], 0 }
   0x4   :  { %12 = vsyncpa [#allocation7], 0 }
   0x5   :  { %14 = vsyncpa [#allocation7 + $0x1], 0 }
   0x6   :  { %15 = vsyncpa [#allocation5], 0  ;;  %s1303_s15 = smov 0   ;;  %s1305_s16 = smov 0  }
   0x7   :  { %s1307_s17 = smov 0   ;;  %s1309_s18 = smov 0  }
   0x8   :  { %s1311_s19 = smov 0   ;;  %s1313_s20 = smov 0  }
   0x9 LB: > { %s1472_s21 = sadd.s32 4294967295, %s1267_s20   ;;  %s30_s22 = sadd.s32 1, %s1263_s19  ;;  %s1267_s20 = sphi %s1313_s20, %s21_s20   ;;  %s1263_s19 = sphi %s1311_s19, %s1483_s19   ;;  %s1259_s18 = sphi %s1309_s18, %s1482_s18   ;;  %s1255_s17 = sphi %s1307_s17, %s1481_s17   ;;  %s1251_s16 = sphi %s1305_s16, %s1480_s16   ;;  %s1247_s15 = sphi %s1303_s15, %s1479_s15  }
   0xa   : > { %p31_p0 = scmp.ge.s32.totalorder %s30_s22, 2  ;;  %s42_s23 = sadd.s32 1, %s1255_s17 }
   0xb   : > { %p49_p1 = scmp.ne.s32.totalorder %s1255_s17, %s1251_s16  ;;  %p50_p2 = scmp.eq.s32.totalorder %s1267_s20, 0 }
   0xc   : > { %s1485_s22 = smov (%p31_p0, %s30_s22), 0  ;;  %p55_p4 = scmp.ne.s32.totalorder %s1251_s16, %s1247_s15 }
   0xd   : > { %p1339_p3 = por %p50_p2, %p49_p1  ;;  %s38_s25 = ssub.s32 %s1263_s19, %s1485_s22 }
   0xe   : > { %p56_p5 = scmp.eq.s32.totalorder %s1472_s21, 0  ;;  %p40_p6 = scmp.eq.s32.totalorder %s38_s25, 0 }
   0xf   : > { %p1035_p8 = scmp.lt.s32.totalorder %s1267_s20, 2  ;;  %s1357_s28 = sand.u32 1, %s1255_s17  }
  0x10   : > { %p1348_p7 = por %p56_p5, %p55_p4  ;;  %s982_s29 = sshll.u32 %s1263_s19, 4 }
  0x11   : > { %s1354_s27 = scalar_select %p40_p6, %s1255_s17, %s42_s23  }
  0x12   : > { %s823_s30 = sshll.u32 %s1357_s28, 5  ;;  %s1476_s0 = sld [smem:[#allocation12_spill]] }
  0x13   : > { %s183_s9 = scalar_lea.vmem [#allocation3], %s823_s30  ;;  %p1366_p9 = pnand %p1035_p8, %p1339_p3 }
  0x14   : > { %s194_s10 = sshll.u32 %s183_s9, 4  ;;  %p829_p10 = scmp.ge.s32.totalorder %s1267_s20, 1  ;;  %s195_s10 = int_to_ptr.vmem [resolvable:$true] %s194_s10 }
  0x15   : > { %s180_s12 = scalar_lea.sflag [#allocation4], %s1357_s28  ;;  %s1269_s13 = smov 512  }
  0x16   : > { %s1270_s14 = smov 256   ;;  %s1271_s15 = smov 16  }
  0x17   : > { %p224_p11 = scmp.lt.s32.totalorder %s1267_s20, 3  ;;  %s826_s23 = sshll.u32 %s1357_s28, 8 }
  0x18   : > { %s191_s7 = scalar_lea.hbm %s1476_s0, %s982_s29  ;;  %s983_s25 = sshll.u32 %s1263_s19, 8 }
  0x19   : > { %s192_s8 = sshll.u32 %s191_s7, 4  ;;  %p225_p12 = pnand %p829_p10, %p224_p11  ;;  %s193_s8 = int_to_ptr.hbm [resolvable:$true] %s192_s8 }
  0x1a   : > { %1031 = dma.hbm_to_vmem [thread:$0]  (!%p1366_p9), %s193_s8, 512, %s195_s10, %s180_s12, %s1269_s13, %s1270_s14, %s1271_s15  }
  0x1b   : > { %s213_s30 = scalar_lea.hbm %s1468_s1, %s983_s25  ;;  %s208_s5 = scalar_lea.vmem [#allocation6], %s826_s23 }
  0x1c   : > { %s216_s6 = sshll.u32 %s208_s5, 4  ;;  %s214_s7 = sshll.u32 %s213_s30, 4  ;;  %s217_s6 = int_to_ptr.vmem [resolvable:$true] %s216_s6  ;;  %s215_s7 = int_to_ptr.hbm [resolvable:$true] %s214_s7 }
  0x1d   : > { %s205_s9 = scalar_lea.sflag [#allocation7], %s1357_s28  ;;  %s1272_s21 = smov 64  }
  0x1e   : > { %s1273_s0 = smov 4   ;;  %228 = sbr.rel (%p225_p12) target bundleno = 516 (0x204), region = 36 }
  0x1f   : > { %1034 = dma.hbm_to_vmem [thread:$0]  (!%p1366_p9), %s215_s7, 4096, %s217_s6, %s205_s9, %s1272_s21, %s1272_s21, %s1273_s0  }
  0x20   : > { %s230_s8 = sand.u32 (!%p225_p12), 1, %s1251_s16  }
  0x21   : > { %s830_s10 = sshll.u32 (!%p225_p12), %s230_s8, 5  ;;  %s231_s12 = scalar_lea.sflag (!%p225_p12), [#allocation4], %s230_s8 }
  0x22   : > { %s1384_s13 = scalar_lea.vmem (!%p225_p12), [#allocation3], %s830_s10 }
  0x23   : > { %1234 = dma.done.wait (%p1348_p7), %s231_s12, 512  }
  0x24   : > { %1236 = vsyncadd (%p1348_p7), %s231_s12, 4294966784  ;;  %s831_s14 = sshll.u32 %s230_s8, 8  ;;  %s241_s28 = scalar_lea.sflag [#allocation7], %s230_s8 }
  0x25   : > { %s1390_s15 = scalar_lea.vmem [#allocation6], %s831_s14 }
  0x26   : > { %1238 = dma.done.wait (%p1348_p7), %s241_s28, 4096  }
  0x27   : > { %1240 = vsyncadd (%p1348_p7), %s241_s28, 4294963200  ;;  %p832_p13 = scmp.ne.s32.totalorder %s1259_s18, 0 }
  0x29   : > { %277 = sbr.rel (%p832_p13) target bundleno = 49 (0x31), region = 48 }
  0x2e   : > { %v1274_v0 = vmov 0.0  }
  0x2f   : > { %278 = vst [vmem:[#allocation2] sm:$0xff] %v1274_v0 }
  0x30   : > { %279 = vst [vmem:[#allocation2 + $0x8] sm:$0xff] %v1274_v0 }
  0x31 PF: > { %v995_v1 = vld [vmem:[%s1390_s15 + $0x38] sm:$0xff]  ;;  %v994_v5 = vld [vmem:[%s1390_s15 + $0x30] sm:$0xff]  ;;  %v993_v9 = vld [vmem:[%s1390_s15 + $0x28] sm:$0xff]  ;;  %p977_p0 = scmp.ne.s32.totalorder %s1259_s18, 1 }
  0x32   : > { %v1003_v2 = vld [vmem:[%s1390_s15 + $0x78] sm:$0xff]  ;;  %562 = vmatpush.bf16.msra.mxu0 %v995_v1  ;;  %v1002_v6 = vld [vmem:[%s1390_s15 + $0x70] sm:$0xff]  ;;  %v1001_v10 = vld [vmem:[%s1390_s15 + $0x68] sm:$0xff] }
  0x33   : > { %v1011_v3 = vld [vmem:[%s1390_s15 + $0xb8] sm:$0xff]  ;;  %576 = vmatpush.bf16.msra.mxu1 %v1003_v2  ;;  %v1010_v7 = vld [vmem:[%s1390_s15 + $0xb0] sm:$0xff]  ;;  %v1009_v11 = vld [vmem:[%s1390_s15 + $0xa8] sm:$0xff] }
  0x34   : > { %v1019_v4 = vld [vmem:[%s1390_s15 + $0xf8] sm:$0xff]  ;;  %590 = vmatpush.bf16.msra.mxu2 %v1011_v3  ;;  %v1018_v8 = vld [vmem:[%s1390_s15 + $0xf0] sm:$0xff]  ;;  %v1017_v12 = vld [vmem:[%s1390_s15 + $0xe8] sm:$0xff] }
  0x35   : > { %604 = vmatpush.bf16.msra.mxu3 %v1019_v4  ;;  %v992_v13 = vld [vmem:[%s1390_s15 + $0x20] sm:$0xff]  ;;  %v991_v17 = vld [vmem:[%s1390_s15 + $0x18] sm:$0xff]  ;;  %v990_v21 = vld [vmem:[%s1390_s15 + $0x10] sm:$0xff] }
  0x36   : > { %563 = vmatpush.bf16.msra.mxu0 %v994_v5  ;;  %v1000_v14 = vld [vmem:[%s1390_s15 + $0x60] sm:$0xff]  ;;  %v999_v18 = vld [vmem:[%s1390_s15 + $0x58] sm:$0xff]  ;;  %v998_v22 = vld [vmem:[%s1390_s15 + $0x50] sm:$0xff] }
  0x37   : > { %577 = vmatpush.bf16.msra.mxu1 %v1002_v6  ;;  %v1008_v15 = vld [vmem:[%s1390_s15 + $0xa0] sm:$0xff]  ;;  %v1007_v19 = vld [vmem:[%s1390_s15 + $0x98] sm:$0xff]  ;;  %v1006_v23 = vld [vmem:[%s1390_s15 + $0x90] sm:$0xff] }
  0x38   : > { %591 = vmatpush.bf16.msra.mxu2 %v1010_v7  ;;  %v1016_v16 = vld [vmem:[%s1390_s15 + $0xe0] sm:$0xff]  ;;  %v1015_v20 = vld [vmem:[%s1390_s15 + $0xd8] sm:$0xff]  ;;  %v1014_v24 = vld [vmem:[%s1390_s15 + $0xd0] sm:$0xff] }
  0x39   : > { %605 = vmatpush.bf16.msra.mxu3 %v1018_v8  ;;  %v989_v25 = vld [vmem:[%s1390_s15 + $0x8] sm:$0xff]  ;;  %v988_v29 = vld [vmem:[%s1390_s15] sm:$0xff]  ;;  %v986_v34 = vld [vmem:[%s1384_s13 + $0xc] sm:$0xf0] }
  0x3a   : > { %564 = vmatpush.bf16.msra.mxu0 %v993_v9  ;;  %v997_v26 = vld [vmem:[%s1390_s15 + $0x48] sm:$0xff]  ;;  %v996_v30 = vld [vmem:[%s1390_s15 + $0x40] sm:$0xff]  ;;  %v837_v36 = vld [vmem:[%s1384_s13 + $0x10] sm:$0xf0] }
  0x3b   : > { %578 = vmatpush.bf16.msra.mxu1 %v1001_v10  ;;  %v1005_v27 = vld [vmem:[%s1390_s15 + $0x88] sm:$0xff]  ;;  %v1004_v31 = vld [vmem:[%s1390_s15 + $0x80] sm:$0xff]  ;;  %v987_v38 = vld [vmem:[%s1384_s13 + $0x14] sm:$0xf0] }
  0x3c   : > { %592 = vmatpush.bf16.msra.mxu2 %v1009_v11  ;;  %v1013_v28 = vld [vmem:[%s1390_s15 + $0xc8] sm:$0xff]  ;;  %v1012_v32 = vld [vmem:[%s1390_s15 + $0xc0] sm:$0xff]  ;;  %v845_v40 = vld [vmem:[%s1384_s13 + $0x18] sm:$0xf0] }
  0x3d   : > { %606 = vmatpush.bf16.msra.mxu3 %v1017_v12  ;;  %v835_v33 = vld [vmem:[%s1384_s13] sm:$0xf]  ;;  %v984_v35 = vld [vmem:[%s1384_s13 + $0x4] sm:$0xf]  ;;  %v843_v37 = vld [vmem:[%s1384_s13 + $0x8] sm:$0xf] }
  0x3e   : > { %565 = vmatpush.bf16.msra.mxu0 %v992_v13  ;;  %v985_v39 = vld [vmem:[%s1384_s13 + $0xc] sm:$0xf]  ;;  %v836_v41 = vor.u32 %v986_v34, %v835_v33  ;;  %v840_v42 = vor.u32 %v984_v35, %v837_v36  ;;  %v844_v43 = vor.u32 %v987_v38, %v843_v37  ;;  %v280_v51 = vld [vmem:[#allocation2] sm:$0xff]  ;;  %v281_v59 = vld [vmem:[#allocation2 + $0x8] sm:$0xff] }
  0x3f   : > { %579 = vmatpush.bf16.msra.mxu1 %v1000_v14  ;;  %v848_v44 = vor.u32 %v985_v39, %v845_v40 }
  0x40   : > { %593 = vmatpush.bf16.msra.mxu2 %v1008_v15 }
  0x41   : > { %607 = vmatpush.bf16.msra.mxu3 %v1016_v16 }
  0x42   : > { %566 = vmatpush.bf16.msra.mxu0 %v991_v17 }
  0x43   : > { %580 = vmatpush.bf16.msra.mxu1 %v999_v18 }
  0x44   : > { %594 = vmatpush.bf16.msra.mxu2 %v1007_v19 }
  0x45   : > { %608 = vmatpush.bf16.msra.mxu3 %v1015_v20 }
  0x46   : > { %567 = vmatpush.bf16.msra.mxu0 %v990_v21 }
  0x47   : > { %581 = vmatpush.bf16.msra.mxu1 %v998_v22 }
  0x48   : > { %595 = vmatpush.bf16.msra.mxu2 %v1006_v23 }
  0x49   : > { %609 = vmatpush.bf16.msra.mxu3 %v1014_v24 }
  0x4a   : > { %568 = vmatpush.bf16.msra.mxu0 %v989_v25 }
  0x4b   : > { %582 = vmatpush.bf16.msra.mxu1 %v997_v26 }
  0x4c   : > { %596 = vmatpush.bf16.msra.mxu2 %v1005_v27 }
  0x4d   : > { %610 = vmatpush.bf16.msra.mxu3 %v1013_v28 }
  0x4e   : > { %569 = vmatpush.bf16.msra.mxu0 %v988_v29 }
  0x4f   : > { %583 = vmatpush.bf16.msra.mxu1 %v996_v30 }
  0x50   : > { %597 = vmatpush.bf16.msra.mxu2 %v1004_v31 }
  0x51   : > { %611 = vmatpush.bf16.msra.mxu3 %v1012_v32  ;;  %570 = vmatmul.bf16.vlgmr.msra.gmra.mxu0 %v836_v41 }
  0x52   : > { %584 = vmatmul.bf16.vlgmr.msra.gmra.mxu1 %v840_v42 }
  0x53   : > { %598 = vmatmul.bf16.vlgmr.msra.gmra.mxu2 %v844_v43 }
  0x54   : > { %612 = vmatmul.bf16.vlgmr.msra.gmra.mxu3 %v848_v44 }
  0xce   : > { %v571_v45 = vpop.f32.mrf.mxu0 }
  0xcf   : > { %v585_v46 = vpop.f32.mrf.mxu1 }
  0xd0   : > { %v586_v47 = vadd.f32 %v585_v46, %v571_v45 }
  0xd6   : > { %v599_v48 = vpop.f32.mrf.mxu2  ;;  %v573_v53 = vpop.f32.mrf.mxu0 }
  0xd7   : > { %v613_v49 = vpop.f32.mrf.mxu3  ;;  %v600_v50 = vadd.f32 %v599_v48, %v586_v47  ;;  %v587_v54 = vpop.f32.mrf.mxu1 }
  0xd8   : > { %v588_v56 = vadd.f32 %v587_v54, %v573_v53 }
  0xd9   : > { %v614_v52 = vadd.f32 %v613_v49, %v600_v50 }
  0xdb   : > { %v618_v55 = vadd.f32 %v614_v52, %v280_v51 }
  0xdd   : > { %620 = vst [vmem:[#allocation2] sm:$0xff] %v618_v55 }
  0xde   : > { %v601_v57 = vpop.f32.mrf.mxu2 }
  0xdf   : > { %v602_v58 = vadd.f32 %v601_v57, %v588_v56  ;;  %v615_v60 = vpop.f32.mrf.mxu3 }
  0xe1   : > { %v616_v61 = vadd.f32 %v615_v60, %v602_v58  ;;  %625 = sbr.rel (%p977_p0) target bundleno = 509 (0x1fd), region = 52 }
  0xe3   : > { %v619_v62 = vadd.f32 %v616_v61, %v281_v59 }
  0xe5   : > { %621 = vst [vmem:[#allocation2 + $0x8] sm:$0xff] %v619_v62 }
  0xe6   : > { %v626_v63 = vld [vmem:[#allocation2] sm:$0xff]  ;;  %v634_v1 = vlaneseq }
  0xe7   : > { %v1095_v0 = vld [vmem:[%s1469_s2] ss:$0 sm:$0xff] }
  0xe8   : > { %v632_v2 = vadd.f32 %v1095_v0, %v626_v63  ;;  %v635_v3 = vand.u32 127, %v634_v1  ;;  %v1096_v52 = vld [vmem:[%s1470_s3] ss:$0 sm:$0xff] }
  0xea   : > { %vm637_vm0 = vcmp.lt.s32.totalorder %v635_v3, 2  ;;  %vm686_vm1 = vcmp.ge.s32.totalorder %v635_v3, 4  ;;  %vm687_vm2 = vcmp.lt.s32.totalorder %v635_v3, 6  ;;  %vm661_vm3 = vcmp.ge.s32.totalorder %v635_v3, 2 }
  0xeb   : > { %v639_v5 = vsel %vm637_vm0, %v632_v2, -1e+30  ;;  %vm688_vm4 = vmand %vm686_vm1, %vm687_vm2  ;;  %vm662_vm5 = vcmp.lt.s32.totalorder %v635_v3, 4 }
  0xec   : > { %v627_v4 = vld [vmem:[#allocation2 + $0x8] sm:$0xff]  ;;  %641 = vmax.xlane.f32.xlu0 %v639_v5  ;;  %v689_v6 = vsel %vm688_vm4, %v632_v2, -1e+30  ;;  %vm663_vm6 = vmand %vm661_vm3, %vm662_vm5 }
  0xed   : > { %691 = vmax.xlane.f32.xlu2 %v689_v6  ;;  %v664_v7 = vsel %vm663_vm6, %v632_v2, -1e+30  ;;  %v633_v8 = vadd.f32 %v1095_v0, %v627_v4 }
  0xee   : > { %666 = vmax.xlane.f32.xlu1 %v664_v7 }
  0xef   : > { %v640_v9 = vsel %vm637_vm0, %v633_v8, -1e+30  ;;  %v690_v10 = vsel %vm688_vm4, %v633_v8, -1e+30  ;;  %v665_v11 = vsel %vm663_vm6, %v633_v8, -1e+30 }
  0xf4   : > { %643 = vmax.xlane.f32.xlu0 %v640_v9 }
  0xf5   : > { %693 = vmax.xlane.f32.xlu2 %v690_v10 }
  0xf6   : > { %668 = vmax.xlane.f32.xlu1 %v665_v11 }
 0x15f   : > { %v642_v12 = vpop.xlane.xlu0 %641 }
 0x160   : > { %v645_v13 = vsub.f32 %v639_v5, %v642_v12  ;;  %v692_v14 = vpop.xlane.xlu2 %691 }
 0x161   : > { %v667_v15 = vpop.xlane.xlu1 %666  ;;  %v695_v29 = vsub.f32 %v689_v6, %v692_v14 }
 0x162   : > { %v647_v16 = vmul.f32 1.442695, %v645_v13  ;;  %v670_v17 = vsub.f32 %v664_v7, %v667_v15 }
 0x163   : > { %v697_v31 = vmul.f32 1.442695, %v695_v29 }
 0x164   : > { %1097 = vpow2.f32 %v647_v16  ;;  %v672_v18 = vmul.f32 1.442695, %v670_v17 }
 0x166   : > { %1099 = vpow2.f32 %v672_v18 }
 0x167   : > { %v644_v19 = vpop.xlane.xlu0 %643 }
 0x168   : > { %v646_v20 = vsub.f32 %v640_v9, %v644_v19  ;;  %v694_v21 = vpop.xlane.xlu2 %693 }
 0x169   : > { %v696_v22 = vsub.f32 %v690_v10, %v694_v21  ;;  %v669_v23 = vpop.xlane.xlu1 %668 }
 0x16a   : > { %v1098_v24 = vpop.eup %1097  ;;  %v649_v25 = vmul.f32 1.442695, %v646_v20  ;;  %v671_v26 = vsub.f32 %v665_v11, %v669_v23 }
 0x16b   : > { %v699_v27 = vmul.f32 1.442695, %v696_v22  ;;  %651 = vadd.xlane.f32.xlu0 %v1098_v24 }
 0x16c   : > { %v1100_v28 = vpop.eup %1099  ;;  %1101 = vpow2.f32 %v649_v25  ;;  %v674_v30 = vmul.f32 1.442695, %v671_v26 }
 0x16d   : > { %1103 = vpow2.f32 %v699_v27  ;;  %676 = vadd.xlane.f32.xlu2 %v1100_v28 }
 0x16e   : > { %1105 = vpow2.f32 %v674_v30 }
 0x16f   : > { %1107 = vpow2.f32 %v697_v31 }
 0x172   : > { %v1102_v32 = vpop.eup %1101 }
 0x173   : > { %v1104_v33 = vpop.eup %1103  ;;  %653 = vadd.xlane.f32.xlu1 %v1102_v32 }
 0x174   : > { %v1106_v34 = vpop.eup %1105 }
 0x175   : > { %703 = vadd.xlane.f32.xlu2 %v1104_v33  ;;  %678 = vadd.xlane.f32.xlu0 %v1106_v34  ;;  %v1108_v35 = vpop.eup %1107 }
 0x17b   : > { %701 = vadd.xlane.f32.xlu1 %v1108_v35 }
 0x1de   : > { %v652_v36 = vpop.xlane.xlu0 %651 }
 0x1df   : > { %1109 = vrcp.f32 %v652_v36 }
 0x1e0   : > { %v677_v37 = vpop.xlane.xlu2 %676 }
 0x1e5   : > { %v1110_v41 = vpop.eup %1109 }
 0x1e6   : > { %v654_v38 = vpop.xlane.xlu1 %653  ;;  %v657_v49 = vmul.f32 %v1110_v41, %v1098_v24 }
 0x1e7   : > { %1111 = vrcp.f32 %v654_v38 }
 0x1e8   : > { %1113 = vrcp.f32 %v677_v37  ;;  %v704_v39 = vpop.xlane.xlu2 %703  ;;  %v679_v40 = vpop.xlane.xlu0 %678 }
 0x1e9   : > { %1115 = vrcp.f32 %v704_v39 }
 0x1ea   : > { %1117 = vrcp.f32 %v679_v40 }
 0x1ed   : > { %v1112_v42 = vpop.eup %1111 }
 0x1ee   : > { %v1114_v43 = vpop.eup %1113  ;;  %v702_v44 = vpop.xlane.xlu1 %701  ;;  %v658_v46 = vmul.f32 %v1112_v42, %v1102_v32 }
 0x1ef   : > { %v1116_v45 = vpop.eup %1115  ;;  %1119 = vrcp.f32 %v702_v44  ;;  %v682_v50 = vmul.f32 %v1114_v43, %v1100_v28 }
 0x1f0   : > { %v1118_v47 = vpop.eup %1117  ;;  %v708_v51 = vmul.f32 %v1116_v45, %v1104_v33 }
 0x1f1   : > { %v683_v48 = vmul.f32 %v1118_v47, %v1106_v34  ;;  %v684_v56 = vadd.f32 %v682_v50, %v657_v49 }
 0x1f3   : > { %v685_v53 = vadd.f32 %v683_v48, %v658_v46 }
 0x1f5   : > { %v1120_v54 = vpop.eup %1119  ;;  %v710_v55 = vadd.f32 %v708_v51, %v685_v53 }
 0x1f6   : > { %v707_v57 = vmul.f32 %v1120_v54, %v1108_v35 }
 0x1f7   : > { %v716_v58 = vmul.f32 %v1096_v52, %v710_v55 }
 0x1f8   : > { %v709_v59 = vadd.f32 %v707_v57, %v684_v56 }
 0x1f9   : > { %718 = vst [vmem:[#allocation8 + $0x8] sm:$0xff] %v716_v58 }
 0x1fa   : > { %v715_v60 = vmul.f32 %v1096_v52, %v709_v59 }
 0x1fc   : > { %717 = vst [vmem:[#allocation8] sm:$0xff] %v715_v60 }
 0x1fd PF: > { %s1478_s11 = sadd.s32 4294967295, %s1267_s20   ;;  %s729_s29 = sshll.u32 %s1471_s4, 4  ;;  %s730_s29 = int_to_ptr.hbm [resolvable:$true] %s729_s29 }
 0x1fe   : > { %p1036_p1 = scmp.eq.s32.totalorder %s1478_s11, 1  ;;  %s1275_s24 = smov [#allocation8]  }
 0x1ff   : > { %s727_s30 = sshll.u32 %s1275_s24, 4  ;;  %s1276_s5 = smov 128   ;;  %s728_s30 = int_to_ptr.vmem [resolvable:$true] %s727_s30 }
 0x200   : > { %s1277_s6 = smov 8  }
 0x201   : > { %1025 = dma.vmem_to_hbm [thread:$0]  (%p1036_p1), %s728_s30, 256, %s730_s29, [#allocation5], %s1276_s5, %s1276_s5, %s1277_s6  }
 0x202   : > { %1242 = dma.done.wait (%p1036_p1), [#allocation5], 256  }
 0x203   : > { %1244 = vsyncadd (%p1036_p1), [#allocation5], 4294967040 }
 0x204 PF: > { %s21_s20 = sadd.s32 1, %s1267_s20   ;;  %s1479_s15 = smov %s1251_s16 }
 0x205   : > { %p18_p2 = scmp.ge.s32.totalorder %s21_s20, 4   ;;  %s1480_s16 = smov %s1255_s17 }
 0x206   : > { %s1481_s17 = smov %s1354_s27  ;;  %s1482_s18 = smov %s1263_s19 }
 0x207   : > { %s1483_s19 = smov %s1485_s22  ;;  %20 = sbr.rel (!%p18_p2) target bundleno = 9 (0x9), region = 95 }
 0x20c   :  { %746 = vsyncpa [#allocation4], 1 }
 0x20d   :  { %748 = vsyncpa [#allocation4 + $0x1], 1 }
 0x20e   :  { %749 = vsyncpa [#allocation7], 1 }
 0x20f   :  { %751 = vsyncpa [#allocation7 + $0x1], 1 }
 0x210   :  { %752 = vsyncpa [#allocation5], 1 }
 0x211   :  { %754 = vsyncpa [#allocation5 + $0x1], 1 }

</bundles_post_ra>
